<compile_context>
chip_gen: v7x
topology: tpu7x:2x2x1
jax: 0.10.0
libtpu: 0.0.40
codegen_flags: <defaults>
</compile_context>

<pallas_src>
import jax
import jax.numpy as jnp
from jax.experimental import pallas as pl
from jax.experimental.pallas import tpu as pltpu


def _round_up(v, m):
    return (v + m - 1) // m * m


def _make_kernel(C, tc, n_cg, H, W, Hp, Wp, Hs):
    """Builds the per-(batch, channel-group) kernel body."""

    def kernel(x_ref, w_ref, o_ref, pad_ref, *acc_refs):
        # x_ref:   (1, tc, H, W)  input channel-group for one batch element
        # w_ref:   (C*9 + 1,)     flat f32 weights + bias in SMEM
        # o_ref:   (1, 1, H, W)   output block (same block for every g)
        # pad_ref: (tc, Hp, Wp)   zero-halo VMEM scratch (persists across steps)
        # acc_refs: 3x (Hs, Wp)   per-kw accumulators (only used when n_cg > 1)
        g = pl.program_id(1)
        bias = w_ref[C * 9]

        # Re-zero the halo scratch at each batch element's first channel-group
        # step.  Cheap (vst slots) and keeps the halo correct even when the
        # parallel batch axis is partitioned across TensorCores.
        @pl.when(g == 0)
        def _():
            pad_ref[...] = jnp.zeros_like(pad_ref)

        a0 = jnp.zeros((Hs, Wp), jnp.float32)
        if n_cg == 1:
            a1 = jnp.full((Hs, Wp), bias, jnp.float32)   # bias folded into init
        else:
            a1 = jnp.zeros((Hs, Wp), jnp.float32)
        a2 = jnp.zeros((Hs, Wp), jnp.float32)

        for i in range(tc):
            # Copy this channel's plane into the zero-halo scratch (aligned
            # (0, 0) offset; interior only -- halo rows/cols stay zero).
            pad_ref[i, 0:H, 0:W] = x_ref[0, i, :, :].astype(jnp.float32)
            plane = pad_ref[i]                                     # (Hp, Wp)
            # Row taps via sublane rolls (XLU); wraps land in zero halo rows
            # or in rows >= H that are never stored.
            r0 = pltpu.roll(plane, shift=1, axis=0)[0:Hs, :]       # row i-1
            r1 = plane[0:Hs, :]                                    # row i
            r2 = pltpu.roll(plane, shift=Hp - 1, axis=0)[0:Hs, :]  # row i+1
            base = (g * tc + i) * 9
            for kh, p in enumerate((r0, r1, r2)):
                a0 = a0 + p * w_ref[base + kh * 3 + 0]
                a1 = a1 + p * w_ref[base + kh * 3 + 1]
                a2 = a2 + p * w_ref[base + kh * 3 + 2]

        def finalize(f0, f1, f2):
            # Column taps: two lane rolls applied once (factored out of the
            # channel loop).  Wraps land in the zero halo lanes; if W is an
            # exact multiple of 128 there is no halo lane, so mask instead.
            b0 = pltpu.roll(f0, shift=1, axis=1)                   # col j-1
            b2 = pltpu.roll(f2, shift=Wp - 1, axis=1)              # col j+1
            if W % 128 == 0:
                lane = jax.lax.broadcasted_iota(jnp.int32, (Hs, Wp), 1)
                b0 = jnp.where(lane == 0, 0.0, b0)
                b2 = jnp.where(lane == W - 1, 0.0, b2)
            res = b0 + f1 + b2
            o_ref[0, 0, :, :] = res[0:H, 0:W].astype(o_ref.dtype)

        if n_cg == 1:
            finalize(a0, a1, a2)
        else:
            a0_ref, a1_ref, a2_ref = acc_refs

            @pl.when(g == 0)
            def _():
                a0_ref[...] = a0
                a1_ref[...] = a1 + bias
                a2_ref[...] = a2

            @pl.when(g > 0)
            def _():
                a0_ref[...] += a0
                a1_ref[...] += a1
                a2_ref[...] += a2

            @pl.when(g == n_cg - 1)
            def _():
                finalize(a0_ref[...], a1_ref[...], a2_ref[...])

    return kernel


def depth_output_subnet_deeptof(x, weight, bias):
    """x: (B, C, H, W) f32; weight: (1, C, 3, 3); bias: (1,).
    Returns (B, 1, H, W), matching PyTorch Conv2d(C, 1, 3, padding=1)."""
    B, C, H, W = x.shape

    # Channels per grid step: largest divisor of C that is <= 8.
    tc = max(d for d in range(1, min(C, 8) + 1) if C % d == 0)
    n_cg = C // tc

    Hs = _round_up(H, 8)          # accumulator sublane extent (no dead rows)
    Hp = _round_up(H + 1, 8)      # halo-padded scratch height (>= H + 1)
    Wp = _round_up(W, 128)        # lane-aligned scratch / accumulator width

    # Flat SMEM parameter vector: [w[c, kh, kw] row-major ..., bias].
    params = jnp.concatenate(
        [weight.reshape(-1).astype(jnp.float32),
         bias.reshape(-1).astype(jnp.float32)])

    kernel = _make_kernel(C, tc, n_cg, H, W, Hp, Wp, Hs)

    scratch_shapes = [pltpu.VMEM((tc, Hp, Wp), jnp.float32)]
    if n_cg > 1:
        scratch_shapes += [pltpu.VMEM((Hs, Wp), jnp.float32)] * 3

    # VMEM budget from actual block bytes (double-buffered in/out + scratch).
    in_block_bytes = tc * H * W * x.dtype.itemsize
    out_block_bytes = H * W * x.dtype.itemsize
    scratch_bytes = (tc * Hp * Wp + (3 * Hs * Wp if n_cg > 1 else 0)) * 4
    vmem_bytes = 2 * (in_block_bytes + out_block_bytes) + scratch_bytes + (2 << 20)
    vmem_limit = min(max(vmem_bytes, 32 << 20), 96 << 20)

    out = pl.pallas_call(
        kernel,
        out_shape=jax.ShapeDtypeStruct((B, 1, H, W), x.dtype),
        grid_spec=pltpu.PrefetchScalarGridSpec(
            num_scalar_prefetch=0,
            grid=(B, n_cg),
            in_specs=[
                pl.BlockSpec((1, tc, H, W), lambda b, g: (b, g, 0, 0)),
                pl.BlockSpec(memory_space=pltpu.MemorySpace.SMEM),
            ],
            out_specs=pl.BlockSpec((1, 1, H, W), lambda b, g: (b, 0, 0, 0)),
            scratch_shapes=scratch_shapes,
        ),
        compiler_params=pltpu.CompilerParams(
            dimension_semantics=("parallel", "arbitrary"),
            vmem_limit_bytes=vmem_limit,
        ),
    )(x, params)
    return out


if __name__ == "__main__":
    B, C, H, W = 2, 4, 16, 16

    key = jax.random.PRNGKey(0)
    kx, kw_key, kb_key = jax.random.split(key, 3)

    x = jax.random.normal(kx, (B, C, H, W), dtype=jnp.float32)
    # Synthetic parameters with nn.Conv2d(C, 1, 3, padding=1) shapes.
    weight = jax.random.normal(kw_key, (1, C, 3, 3), dtype=jnp.float32) * 0.1
    bias = jax.random.normal(kb_key, (1,), dtype=jnp.float32) * 0.1

    out = depth_output_subnet_deeptof(x, weight, bias)
    out = jax.block_until_ready(out)

    # Reference check against XLA conv (NCHW, same padding).
    ref = jax.lax.conv_general_dilated(
        x, weight, window_strides=(1, 1), padding="SAME",
        dimension_numbers=("NCHW", "OIHW", "NCHW")) + bias[None, :, None, None]
    assert out.shape == (B, 1, H, W)
    assert jnp.allclose(out, ref, atol=1e-4, rtol=1e-4)

    print("KERNEL_OK")
</pallas_src>

<mosaic_0001>
module attributes {stable_mosaic.version = 11 : i64} {
  func.func @kernel(%arg0: i32, %arg1: i32, %arg2: memref<1x4x16x16xf32, #tpu.memory_space<vmem>>, %arg3: memref<37xf32, #tpu.memory_space<smem>>, %arg4: memref<1x1x16x16xf32, #tpu.memory_space<vmem>>, %arg5: memref<4x24x128xf32, #tpu.memory_space<vmem>>) attributes {dimension_semantics = [#tpu.dimension_semantics<parallel>, #tpu.dimension_semantics<arbitrary>], iteration_bounds = array<i64: 2, 1>, scalar_prefetch = 0 : i64, scratch_operands = 1 : i64, tpu.core_type = #tpu.core_type<tc>, window_params = [{transform_indices = @transform_0, window_bounds = array<i64: 1, 4, 16, 16>}, {transform_indices = @transform_1, window_bounds = array<i64: 37>}, {transform_indices = @transform_2, window_bounds = array<i64: 1, 1, 16, 16>}]} {
    %c36 = arith.constant 36 : index
    %0 = memref.load %arg3[%c36] : memref<37xf32, #tpu.memory_space<smem>>
    %c0_i32 = arith.constant 0 : i32
    %1 = arith.cmpi eq, %arg1, %c0_i32 : i32
    %2 = arith.extui %1 : i1 to i32
    %c0_i32_0 = arith.constant 0 : i32
    %3 = arith.cmpi ne, %2, %c0_i32_0 : i32
    scf.if %3 {
      %cst_128 = arith.constant 0.000000e+00 : f32
      %327 = vector.broadcast %cst_128 : f32 to vector<4x24x128xf32>
      %c0_129 = arith.constant 0 : index
      %c0_130 = arith.constant 0 : index
      %c0_131 = arith.constant 0 : index
      %328 = vector.load %arg5[%c0_129, %c0_130, %c0_131] : memref<4x24x128xf32, #tpu.memory_space<vmem>>, vector<4x24x128xf32>
      tpu.vector_store %arg5[%c0_129, %c0_130, %c0_131], %327 {strides = array<i32>} : memref<4x24x128xf32, #tpu.memory_space<vmem>>, vector<4x24x128xf32>,
    } else {
    }
    %cst = arith.constant 0.000000e+00 : f32
    %4 = vector.broadcast %cst : f32 to vector<16x128xf32>
    %5 = vector.broadcast %0 : f32 to vector<16x128xf32>
    %cst_1 = arith.constant 0.000000e+00 : f32
    %6 = vector.broadcast %cst_1 : f32 to vector<16x128xf32>
    %c0 = arith.constant 0 : index
    %c0_2 = arith.constant 0 : index
    %c0_3 = arith.constant 0 : index
    %c0_4 = arith.constant 0 : index
    %7 = vector.load %arg2[%c0, %c0_2, %c0_3, %c0_4] : memref<1x4x16x16xf32, #tpu.memory_space<vmem>>, vector<1x1x16x16xf32>
    %8 = vector.shape_cast %7 : vector<1x1x16x16xf32> to vector<16x16xf32>
    %c0_5 = arith.constant 0 : index
    %c0_6 = arith.constant 0 : index
    %c0_7 = arith.constant 0 : index
    %9 = vector.load %arg5[%c0_5, %c0_6, %c0_7] : memref<4x24x128xf32, #tpu.memory_space<vmem>>, vector<1x16x16xf32>
    %10 = vector.shape_cast %9 : vector<1x16x16xf32> to vector<16x16xf32>
    %11 = vector.shape_cast %8 : vector<16x16xf32> to vector<1x16x16xf32>
    tpu.vector_store %arg5[%c0_5, %c0_6, %c0_7], %11 {strides = array<i32>} : memref<4x24x128xf32, #tpu.memory_space<vmem>>, vector<1x16x16xf32>,
    %c0_8 = arith.constant 0 : index
    %c0_9 = arith.constant 0 : index
    %c0_10 = arith.constant 0 : index
    %12 = vector.load %arg5[%c0_8, %c0_9, %c0_10] : memref<4x24x128xf32, #tpu.memory_space<vmem>>, vector<1x24x128xf32>
    %13 = vector.shape_cast %12 : vector<1x24x128xf32> to vector<24x128xf32>
    %c1_i32 = arith.constant 1 : i32
    %14 = tpu.dynamic_rotate %13 by %c1_i32 dim 0 : vector<24x128xf32>, i32 -> vector<24x128xf32>
    %15 = vector.extract_strided_slice %14 {offsets = [0, 0], sizes = [16, 128], strides = [1, 1]} : vector<24x128xf32> to vector<16x128xf32>
    %16 = vector.extract_strided_slice %13 {offsets = [0, 0], sizes = [16, 128], strides = [1, 1]} : vector<24x128xf32> to vector<16x128xf32>
    %c23_i32 = arith.constant 23 : i32
    %17 = tpu.dynamic_rotate %13 by %c23_i32 dim 0 : vector<24x128xf32>, i32 -> vector<24x128xf32>
    %18 = vector.extract_strided_slice %17 {offsets = [0, 0], sizes = [16, 128], strides = [1, 1]} : vector<24x128xf32> to vector<16x128xf32>
    %c4_i32 = arith.constant 4 : i32
    %19 = arith.muli %arg1, %c4_i32 : i32
    %c0_i32_11 = arith.constant 0 : i32
    %20 = arith.addi %19, %c0_i32_11 : i32
    %c9_i32 = arith.constant 9 : i32
    %21 = arith.muli %20, %c9_i32 : i32
    %c0_i32_12 = arith.constant 0 : i32
    %22 = arith.addi %21, %c0_i32_12 : i32
    %c0_i32_13 = arith.constant 0 : i32
    %23 = arith.addi %22, %c0_i32_13 : i32
    %24 = arith.index_cast %23 : i32 to index
    %25 = memref.load %arg3[%24] : memref<37xf32, #tpu.memory_space<smem>>
    %26 = vector.broadcast %25 : f32 to vector<16x128xf32>
    %27 = arith.mulf %15, %26 : vector<16x128xf32>
    %28 = arith.addf %4, %27 : vector<16x128xf32>
    %c0_i32_14 = arith.constant 0 : i32
    %29 = arith.addi %21, %c0_i32_14 : i32
    %c1_i32_15 = arith.constant 1 : i32
    %30 = arith.addi %29, %c1_i32_15 : i32
    %31 = arith.index_cast %30 : i32 to index
    %32 = memref.load %arg3[%31] : memref<37xf32, #tpu.memory_space<smem>>
    %33 = vector.broadcast %32 : f32 to vector<16x128xf32>
    %34 = arith.mulf %15, %33 : vector<16x128xf32>
    %35 = arith.addf %5, %34 : vector<16x128xf32>
    %c0_i32_16 = arith.constant 0 : i32
    %36 = arith.addi %21, %c0_i32_16 : i32
    %c2_i32 = arith.constant 2 : i32
    %37 = arith.addi %36, %c2_i32 : i32
    %38 = arith.index_cast %37 : i32 to index
    %39 = memref.load %arg3[%38] : memref<37xf32, #tpu.memory_space<smem>>
    %40 = vector.broadcast %39 : f32 to vector<16x128xf32>
    %41 = arith.mulf %15, %40 : vector<16x128xf32>
    %42 = arith.addf %6, %41 : vector<16x128xf32>
    %c3_i32 = arith.constant 3 : i32
    %43 = arith.addi %21, %c3_i32 : i32
    %c0_i32_17 = arith.constant 0 : i32
    %44 = arith.addi %43, %c0_i32_17 : i32
    %45 = arith.index_cast %44 : i32 to index
    %46 = memref.load %arg3[%45] : memref<37xf32, #tpu.memory_space<smem>>
    %47 = vector.broadcast %46 : f32 to vector<16x128xf32>
    %48 = arith.mulf %16, %47 : vector<16x128xf32>
    %49 = arith.addf %28, %48 : vector<16x128xf32>
    %c3_i32_18 = arith.constant 3 : i32
    %50 = arith.addi %21, %c3_i32_18 : i32
    %c1_i32_19 = arith.constant 1 : i32
    %51 = arith.addi %50, %c1_i32_19 : i32
    %52 = arith.index_cast %51 : i32 to index
    %53 = memref.load %arg3[%52] : memref<37xf32, #tpu.memory_space<smem>>
    %54 = vector.broadcast %53 : f32 to vector<16x128xf32>
    %55 = arith.mulf %16, %54 : vector<16x128xf32>
    %56 = arith.addf %35, %55 : vector<16x128xf32>
    %c3_i32_20 = arith.constant 3 : i32
    %57 = arith.addi %21, %c3_i32_20 : i32
    %c2_i32_21 = arith.constant 2 : i32
    %58 = arith.addi %57, %c2_i32_21 : i32
    %59 = arith.index_cast %58 : i32 to index
    %60 = memref.load %arg3[%59] : memref<37xf32, #tpu.memory_space<smem>>
    %61 = vector.broadcast %60 : f32 to vector<16x128xf32>
    %62 = arith.mulf %16, %61 : vector<16x128xf32>
    %63 = arith.addf %42, %62 : vector<16x128xf32>
    %c6_i32 = arith.constant 6 : i32
    %64 = arith.addi %21, %c6_i32 : i32
    %c0_i32_22 = arith.constant 0 : i32
    %65 = arith.addi %64, %c0_i32_22 : i32
    %66 = arith.index_cast %65 : i32 to index
    %67 = memref.load %arg3[%66] : memref<37xf32, #tpu.memory_space<smem>>
    %68 = vector.broadcast %67 : f32 to vector<16x128xf32>
    %69 = arith.mulf %18, %68 : vector<16x128xf32>
    %70 = arith.addf %49, %69 : vector<16x128xf32>
    %c6_i32_23 = arith.constant 6 : i32
    %71 = arith.addi %21, %c6_i32_23 : i32
    %c1_i32_24 = arith.constant 1 : i32
    %72 = arith.addi %71, %c1_i32_24 : i32
    %73 = arith.index_cast %72 : i32 to index
    %74 = memref.load %arg3[%73] : memref<37xf32, #tpu.memory_space<smem>>
    %75 = vector.broadcast %74 : f32 to vector<16x128xf32>
    %76 = arith.mulf %18, %75 : vector<16x128xf32>
    %77 = arith.addf %56, %76 : vector<16x128xf32>
    %c6_i32_25 = arith.constant 6 : i32
    %78 = arith.addi %21, %c6_i32_25 : i32
    %c2_i32_26 = arith.constant 2 : i32
    %79 = arith.addi %78, %c2_i32_26 : i32
    %80 = arith.index_cast %79 : i32 to index
    %81 = memref.load %arg3[%80] : memref<37xf32, #tpu.memory_space<smem>>
    %82 = vector.broadcast %81 : f32 to vector<16x128xf32>
    %83 = arith.mulf %18, %82 : vector<16x128xf32>
    %84 = arith.addf %63, %83 : vector<16x128xf32>
    %c0_27 = arith.constant 0 : index
    %c1 = arith.constant 1 : index
    %c0_28 = arith.constant 0 : index
    %c0_29 = arith.constant 0 : index
    %85 = vector.load %arg2[%c0_27, %c1, %c0_28, %c0_29] : memref<1x4x16x16xf32, #tpu.memory_space<vmem>>, vector<1x1x16x16xf32>
    %86 = vector.shape_cast %85 : vector<1x1x16x16xf32> to vector<16x16xf32>
    %c1_30 = arith.constant 1 : index
    %c0_31 = arith.constant 0 : index
    %c0_32 = arith.constant 0 : index
    %87 = vector.load %arg5[%c1_30, %c0_31, %c0_32] : memref<4x24x128xf32, #tpu.memory_space<vmem>>, vector<1x16x16xf32>
    %88 = vector.shape_cast %87 : vector<1x16x16xf32> to vector<16x16xf32>
    %89 = vector.shape_cast %86 : vector<16x16xf32> to vector<1x16x16xf32>
    tpu.vector_store %arg5[%c1_30, %c0_31, %c0_32], %89 {strides = array<i32>} : memref<4x24x128xf32, #tpu.memory_space<vmem>>, vector<1x16x16xf32>,
    %c1_33 = arith.constant 1 : index
    %c0_34 = arith.constant 0 : index
    %c0_35 = arith.constant 0 : index
    %90 = vector.load %arg5[%c1_33, %c0_34, %c0_35] : memref<4x24x128xf32, #tpu.memory_space<vmem>>, vector<1x24x128xf32>
    %91 = vector.shape_cast %90 : vector<1x24x128xf32> to vector<24x128xf32>
    %c1_i32_36 = arith.constant 1 : i32
    %92 = tpu.dynamic_rotate %91 by %c1_i32_36 dim 0 : vector<24x128xf32>, i32 -> vector<24x128xf32>
    %93 = vector.extract_strided_slice %92 {offsets = [0, 0], sizes = [16, 128], strides = [1, 1]} : vector<24x128xf32> to vector<16x128xf32>
    %94 = vector.extract_strided_slice %91 {offsets = [0, 0], sizes = [16, 128], strides = [1, 1]} : vector<24x128xf32> to vector<16x128xf32>
    %c23_i32_37 = arith.constant 23 : i32
    %95 = tpu.dynamic_rotate %91 by %c23_i32_37 dim 0 : vector<24x128xf32>, i32 -> vector<24x128xf32>
    %96 = vector.extract_strided_slice %95 {offsets = [0, 0], sizes = [16, 128], strides = [1, 1]} : vector<24x128xf32> to vector<16x128xf32>
    %c4_i32_38 = arith.constant 4 : i32
    %97 = arith.muli %arg1, %c4_i32_38 : i32
    %c1_i32_39 = arith.constant 1 : i32
    %98 = arith.addi %97, %c1_i32_39 : i32
    %c9_i32_40 = arith.constant 9 : i32
    %99 = arith.muli %98, %c9_i32_40 : i32
    %c0_i32_41 = arith.constant 0 : i32
    %100 = arith.addi %99, %c0_i32_41 : i32
    %c0_i32_42 = arith.constant 0 : i32
    %101 = arith.addi %100, %c0_i32_42 : i32
    %102 = arith.index_cast %101 : i32 to index
    %103 = memref.load %arg3[%102] : memref<37xf32, #tpu.memory_space<smem>>
    %104 = vector.broadcast %103 : f32 to vector<16x128xf32>
    %105 = arith.mulf %93, %104 : vector<16x128xf32>
    %106 = arith.addf %70, %105 : vector<16x128xf32>
    %c0_i32_43 = arith.constant 0 : i32
    %107 = arith.addi %99, %c0_i32_43 : i32
    %c1_i32_44 = arith.constant 1 : i32
    %108 = arith.addi %107, %c1_i32_44 : i32
    %109 = arith.index_cast %108 : i32 to index
    %110 = memref.load %arg3[%109] : memref<37xf32, #tpu.memory_space<smem>>
    %111 = vector.broadcast %110 : f32 to vector<16x128xf32>
    %112 = arith.mulf %93, %111 : vector<16x128xf32>
    %113 = arith.addf %77, %112 : vector<16x128xf32>
    %c0_i32_45 = arith.constant 0 : i32
    %114 = arith.addi %99, %c0_i32_45 : i32
    %c2_i32_46 = arith.constant 2 : i32
    %115 = arith.addi %114, %c2_i32_46 : i32
    %116 = arith.index_cast %115 : i32 to index
    %117 = memref.load %arg3[%116] : memref<37xf32, #tpu.memory_space<smem>>
    %118 = vector.broadcast %117 : f32 to vector<16x128xf32>
    %119 = arith.mulf %93, %118 : vector<16x128xf32>
    %120 = arith.addf %84, %119 : vector<16x128xf32>
    %c3_i32_47 = arith.constant 3 : i32
    %121 = arith.addi %99, %c3_i32_47 : i32
    %c0_i32_48 = arith.constant 0 : i32
    %122 = arith.addi %121, %c0_i32_48 : i32
    %123 = arith.index_cast %122 : i32 to index
    %124 = memref.load %arg3[%123] : memref<37xf32, #tpu.memory_space<smem>>
    %125 = vector.broadcast %124 : f32 to vector<16x128xf32>
    %126 = arith.mulf %94, %125 : vector<16x128xf32>
    %127 = arith.addf %106, %126 : vector<16x128xf32>
    %c3_i32_49 = arith.constant 3 : i32
    %128 = arith.addi %99, %c3_i32_49 : i32
    %c1_i32_50 = arith.constant 1 : i32
    %129 = arith.addi %128, %c1_i32_50 : i32
    %130 = arith.index_cast %129 : i32 to index
    %131 = memref.load %arg3[%130] : memref<37xf32, #tpu.memory_space<smem>>
    %132 = vector.broadcast %131 : f32 to vector<16x128xf32>
    %133 = arith.mulf %94, %132 : vector<16x128xf32>
    %134 = arith.addf %113, %133 : vector<16x128xf32>
    %c3_i32_51 = arith.constant 3 : i32
    %135 = arith.addi %99, %c3_i32_51 : i32
    %c2_i32_52 = arith.constant 2 : i32
    %136 = arith.addi %135, %c2_i32_52 : i32
    %137 = arith.index_cast %136 : i32 to index
    %138 = memref.load %arg3[%137] : memref<37xf32, #tpu.memory_space<smem>>
    %139 = vector.broadcast %138 : f32 to vector<16x128xf32>
    %140 = arith.mulf %94, %139 : vector<16x128xf32>
    %141 = arith.addf %120, %140 : vector<16x128xf32>
    %c6_i32_53 = arith.constant 6 : i32
    %142 = arith.addi %99, %c6_i32_53 : i32
    %c0_i32_54 = arith.constant 0 : i32
    %143 = arith.addi %142, %c0_i32_54 : i32
    %144 = arith.index_cast %143 : i32 to index
    %145 = memref.load %arg3[%144] : memref<37xf32, #tpu.memory_space<smem>>
    %146 = vector.broadcast %145 : f32 to vector<16x128xf32>
    %147 = arith.mulf %96, %146 : vector<16x128xf32>
    %148 = arith.addf %127, %147 : vector<16x128xf32>
    %c6_i32_55 = arith.constant 6 : i32
    %149 = arith.addi %99, %c6_i32_55 : i32
    %c1_i32_56 = arith.constant 1 : i32
    %150 = arith.addi %149, %c1_i32_56 : i32
    %151 = arith.index_cast %150 : i32 to index
    %152 = memref.load %arg3[%151] : memref<37xf32, #tpu.memory_space<smem>>
    %153 = vector.broadcast %152 : f32 to vector<16x128xf32>
    %154 = arith.mulf %96, %153 : vector<16x128xf32>
    %155 = arith.addf %134, %154 : vector<16x128xf32>
    %c6_i32_57 = arith.constant 6 : i32
    %156 = arith.addi %99, %c6_i32_57 : i32
    %c2_i32_58 = arith.constant 2 : i32
    %157 = arith.addi %156, %c2_i32_58 : i32
    %158 = arith.index_cast %157 : i32 to index
    %159 = memref.load %arg3[%158] : memref<37xf32, #tpu.memory_space<smem>>
    %160 = vector.broadcast %159 : f32 to vector<16x128xf32>
    %161 = arith.mulf %96, %160 : vector<16x128xf32>
    %162 = arith.addf %141, %161 : vector<16x128xf32>
    %c0_59 = arith.constant 0 : index
    %c2 = arith.constant 2 : index
    %c0_60 = arith.constant 0 : index
    %c0_61 = arith.constant 0 : index
    %163 = vector.load %arg2[%c0_59, %c2, %c0_60, %c0_61] : memref<1x4x16x16xf32, #tpu.memory_space<vmem>>, vector<1x1x16x16xf32>
    %164 = vector.shape_cast %163 : vector<1x1x16x16xf32> to vector<16x16xf32>
    %c2_62 = arith.constant 2 : index
    %c0_63 = arith.constant 0 : index
    %c0_64 = arith.constant 0 : index
    %165 = vector.load %arg5[%c2_62, %c0_63, %c0_64] : memref<4x24x128xf32, #tpu.memory_space<vmem>>, vector<1x16x16xf32>
    %166 = vector.shape_cast %165 : vector<1x16x16xf32> to vector<16x16xf32>
    %167 = vector.shape_cast %164 : vector<16x16xf32> to vector<1x16x16xf32>
    tpu.vector_store %arg5[%c2_62, %c0_63, %c0_64], %167 {strides = array<i32>} : memref<4x24x128xf32, #tpu.memory_space<vmem>>, vector<1x16x16xf32>,
    %c2_65 = arith.constant 2 : index
    %c0_66 = arith.constant 0 : index
    %c0_67 = arith.constant 0 : index
    %168 = vector.load %arg5[%c2_65, %c0_66, %c0_67] : memref<4x24x128xf32, #tpu.memory_space<vmem>>, vector<1x24x128xf32>
    %169 = vector.shape_cast %168 : vector<1x24x128xf32> to vector<24x128xf32>
    %c1_i32_68 = arith.constant 1 : i32
    %170 = tpu.dynamic_rotate %169 by %c1_i32_68 dim 0 : vector<24x128xf32>, i32 -> vector<24x128xf32>
    %171 = vector.extract_strided_slice %170 {offsets = [0, 0], sizes = [16, 128], strides = [1, 1]} : vector<24x128xf32> to vector<16x128xf32>
    %172 = vector.extract_strided_slice %169 {offsets = [0, 0], sizes = [16, 128], strides = [1, 1]} : vector<24x128xf32> to vector<16x128xf32>
    %c23_i32_69 = arith.constant 23 : i32
    %173 = tpu.dynamic_rotate %169 by %c23_i32_69 dim 0 : vector<24x128xf32>, i32 -> vector<24x128xf32>
    %174 = vector.extract_strided_slice %173 {offsets = [0, 0], sizes = [16, 128], strides = [1, 1]} : vector<24x128xf32> to vector<16x128xf32>
    %c4_i32_70 = arith.constant 4 : i32
    %175 = arith.muli %arg1, %c4_i32_70 : i32
    %c2_i32_71 = arith.constant 2 : i32
    %176 = arith.addi %175, %c2_i32_71 : i32
    %c9_i32_72 = arith.constant 9 : i32
    %177 = arith.muli %176, %c9_i32_72 : i32
    %c0_i32_73 = arith.constant 0 : i32
    %178 = arith.addi %177, %c0_i32_73 : i32
    %c0_i32_74 = arith.constant 0 : i32
    %179 = arith.addi %178, %c0_i32_74 : i32
    %180 = arith.index_cast %179 : i32 to index
    %181 = memref.load %arg3[%180] : memref<37xf32, #tpu.memory_space<smem>>
    %182 = vector.broadcast %181 : f32 to vector<16x128xf32>
    %183 = arith.mulf %171, %182 : vector<16x128xf32>
    %184 = arith.addf %148, %183 : vector<16x128xf32>
    %c0_i32_75 = arith.constant 0 : i32
    %185 = arith.addi %177, %c0_i32_75 : i32
    %c1_i32_76 = arith.constant 1 : i32
    %186 = arith.addi %185, %c1_i32_76 : i32
    %187 = arith.index_cast %186 : i32 to index
    %188 = memref.load %arg3[%187] : memref<37xf32, #tpu.memory_space<smem>>
    %189 = vector.broadcast %188 : f32 to vector<16x128xf32>
    %190 = arith.mulf %171, %189 : vector<16x128xf32>
    %191 = arith.addf %155, %190 : vector<16x128xf32>
    %c0_i32_77 = arith.constant 0 : i32
    %192 = arith.addi %177, %c0_i32_77 : i32
    %c2_i32_78 = arith.constant 2 : i32
    %193 = arith.addi %192, %c2_i32_78 : i32
    %194 = arith.index_cast %193 : i32 to index
    %195 = memref.load %arg3[%194] : memref<37xf32, #tpu.memory_space<smem>>
    %196 = vector.broadcast %195 : f32 to vector<16x128xf32>
    %197 = arith.mulf %171, %196 : vector<16x128xf32>
    %198 = arith.addf %162, %197 : vector<16x128xf32>
    %c3_i32_79 = arith.constant 3 : i32
    %199 = arith.addi %177, %c3_i32_79 : i32
    %c0_i32_80 = arith.constant 0 : i32
    %200 = arith.addi %199, %c0_i32_80 : i32
    %201 = arith.index_cast %200 : i32 to index
    %202 = memref.load %arg3[%201] : memref<37xf32, #tpu.memory_space<smem>>
    %203 = vector.broadcast %202 : f32 to vector<16x128xf32>
    %204 = arith.mulf %172, %203 : vector<16x128xf32>
    %205 = arith.addf %184, %204 : vector<16x128xf32>
    %c3_i32_81 = arith.constant 3 : i32
    %206 = arith.addi %177, %c3_i32_81 : i32
    %c1_i32_82 = arith.constant 1 : i32
    %207 = arith.addi %206, %c1_i32_82 : i32
    %208 = arith.index_cast %207 : i32 to index
    %209 = memref.load %arg3[%208] : memref<37xf32, #tpu.memory_space<smem>>
    %210 = vector.broadcast %209 : f32 to vector<16x128xf32>
    %211 = arith.mulf %172, %210 : vector<16x128xf32>
    %212 = arith.addf %191, %211 : vector<16x128xf32>
    %c3_i32_83 = arith.constant 3 : i32
    %213 = arith.addi %177, %c3_i32_83 : i32
    %c2_i32_84 = arith.constant 2 : i32
    %214 = arith.addi %213, %c2_i32_84 : i32
    %215 = arith.index_cast %214 : i32 to index
    %216 = memref.load %arg3[%215] : memref<37xf32, #tpu.memory_space<smem>>
    %217 = vector.broadcast %216 : f32 to vector<16x128xf32>
    %218 = arith.mulf %172, %217 : vector<16x128xf32>
    %219 = arith.addf %198, %218 : vector<16x128xf32>
    %c6_i32_85 = arith.constant 6 : i32
    %220 = arith.addi %177, %c6_i32_85 : i32
    %c0_i32_86 = arith.constant 0 : i32
    %221 = arith.addi %220, %c0_i32_86 : i32
    %222 = arith.index_cast %221 : i32 to index
    %223 = memref.load %arg3[%222] : memref<37xf32, #tpu.memory_space<smem>>
    %224 = vector.broadcast %223 : f32 to vector<16x128xf32>
    %225 = arith.mulf %174, %224 : vector<16x128xf32>
    %226 = arith.addf %205, %225 : vector<16x128xf32>
    %c6_i32_87 = arith.constant 6 : i32
    %227 = arith.addi %177, %c6_i32_87 : i32
    %c1_i32_88 = arith.constant 1 : i32
    %228 = arith.addi %227, %c1_i32_88 : i32
    %229 = arith.index_cast %228 : i32 to index
    %230 = memref.load %arg3[%229] : memref<37xf32, #tpu.memory_space<smem>>
    %231 = vector.broadcast %230 : f32 to vector<16x128xf32>
    %232 = arith.mulf %174, %231 : vector<16x128xf32>
    %233 = arith.addf %212, %232 : vector<16x128xf32>
    %c6_i32_89 = arith.constant 6 : i32
    %234 = arith.addi %177, %c6_i32_89 : i32
    %c2_i32_90 = arith.constant 2 : i32
    %235 = arith.addi %234, %c2_i32_90 : i32
    %236 = arith.index_cast %235 : i32 to index
    %237 = memref.load %arg3[%236] : memref<37xf32, #tpu.memory_space<smem>>
    %238 = vector.broadcast %237 : f32 to vector<16x128xf32>
    %239 = arith.mulf %174, %238 : vector<16x128xf32>
    %240 = arith.addf %219, %239 : vector<16x128xf32>
    %c0_91 = arith.constant 0 : index
    %c3 = arith.constant 3 : index
    %c0_92 = arith.constant 0 : index
    %c0_93 = arith.constant 0 : index
    %241 = vector.load %arg2[%c0_91, %c3, %c0_92, %c0_93] : memref<1x4x16x16xf32, #tpu.memory_space<vmem>>, vector<1x1x16x16xf32>
    %242 = vector.shape_cast %241 : vector<1x1x16x16xf32> to vector<16x16xf32>
    %c3_94 = arith.constant 3 : index
    %c0_95 = arith.constant 0 : index
    %c0_96 = arith.constant 0 : index
    %243 = vector.load %arg5[%c3_94, %c0_95, %c0_96] : memref<4x24x128xf32, #tpu.memory_space<vmem>>, vector<1x16x16xf32>
    %244 = vector.shape_cast %243 : vector<1x16x16xf32> to vector<16x16xf32>
    %245 = vector.shape_cast %242 : vector<16x16xf32> to vector<1x16x16xf32>
    tpu.vector_store %arg5[%c3_94, %c0_95, %c0_96], %245 {strides = array<i32>} : memref<4x24x128xf32, #tpu.memory_space<vmem>>, vector<1x16x16xf32>,
    %c3_97 = arith.constant 3 : index
    %c0_98 = arith.constant 0 : index
    %c0_99 = arith.constant 0 : index
    %246 = vector.load %arg5[%c3_97, %c0_98, %c0_99] : memref<4x24x128xf32, #tpu.memory_space<vmem>>, vector<1x24x128xf32>
    %247 = vector.shape_cast %246 : vector<1x24x128xf32> to vector<24x128xf32>
    %c1_i32_100 = arith.constant 1 : i32
    %248 = tpu.dynamic_rotate %247 by %c1_i32_100 dim 0 : vector<24x128xf32>, i32 -> vector<24x128xf32>
    %249 = vector.extract_strided_slice %248 {offsets = [0, 0], sizes = [16, 128], strides = [1, 1]} : vector<24x128xf32> to vector<16x128xf32>
    %250 = vector.extract_strided_slice %247 {offsets = [0, 0], sizes = [16, 128], strides = [1, 1]} : vector<24x128xf32> to vector<16x128xf32>
    %c23_i32_101 = arith.constant 23 : i32
    %251 = tpu.dynamic_rotate %247 by %c23_i32_101 dim 0 : vector<24x128xf32>, i32 -> vector<24x128xf32>
    %252 = vector.extract_strided_slice %251 {offsets = [0, 0], sizes = [16, 128], strides = [1, 1]} : vector<24x128xf32> to vector<16x128xf32>
    %c4_i32_102 = arith.constant 4 : i32
    %253 = arith.muli %arg1, %c4_i32_102 : i32
    %c3_i32_103 = arith.constant 3 : i32
    %254 = arith.addi %253, %c3_i32_103 : i32
    %c9_i32_104 = arith.constant 9 : i32
    %255 = arith.muli %254, %c9_i32_104 : i32
    %c0_i32_105 = arith.constant 0 : i32
    %256 = arith.addi %255, %c0_i32_105 : i32
    %c0_i32_106 = arith.constant 0 : i32
    %257 = arith.addi %256, %c0_i32_106 : i32
    %258 = arith.index_cast %257 : i32 to index
    %259 = memref.load %arg3[%258] : memref<37xf32, #tpu.memory_space<smem>>
    %260 = vector.broadcast %259 : f32 to vector<16x128xf32>
    %261 = arith.mulf %249, %260 : vector<16x128xf32>
    %262 = arith.addf %226, %261 : vector<16x128xf32>
    %c0_i32_107 = arith.constant 0 : i32
    %263 = arith.addi %255, %c0_i32_107 : i32
    %c1_i32_108 = arith.constant 1 : i32
    %264 = arith.addi %263, %c1_i32_108 : i32
    %265 = arith.index_cast %264 : i32 to index
    %266 = memref.load %arg3[%265] : memref<37xf32, #tpu.memory_space<smem>>
    %267 = vector.broadcast %266 : f32 to vector<16x128xf32>
    %268 = arith.mulf %249, %267 : vector<16x128xf32>
    %269 = arith.addf %233, %268 : vector<16x128xf32>
    %c0_i32_109 = arith.constant 0 : i32
    %270 = arith.addi %255, %c0_i32_109 : i32
    %c2_i32_110 = arith.constant 2 : i32
    %271 = arith.addi %270, %c2_i32_110 : i32
    %272 = arith.index_cast %271 : i32 to index
    %273 = memref.load %arg3[%272] : memref<37xf32, #tpu.memory_space<smem>>
    %274 = vector.broadcast %273 : f32 to vector<16x128xf32>
    %275 = arith.mulf %249, %274 : vector<16x128xf32>
    %276 = arith.addf %240, %275 : vector<16x128xf32>
    %c3_i32_111 = arith.constant 3 : i32
    %277 = arith.addi %255, %c3_i32_111 : i32
    %c0_i32_112 = arith.constant 0 : i32
    %278 = arith.addi %277, %c0_i32_112 : i32
    %279 = arith.index_cast %278 : i32 to index
    %280 = memref.load %arg3[%279] : memref<37xf32, #tpu.memory_space<smem>>
    %281 = vector.broadcast %280 : f32 to vector<16x128xf32>
    %282 = arith.mulf %250, %281 : vector<16x128xf32>
    %283 = arith.addf %262, %282 : vector<16x128xf32>
    %c3_i32_113 = arith.constant 3 : i32
    %284 = arith.addi %255, %c3_i32_113 : i32
    %c1_i32_114 = arith.constant 1 : i32
    %285 = arith.addi %284, %c1_i32_114 : i32
    %286 = arith.index_cast %285 : i32 to index
    %287 = memref.load %arg3[%286] : memref<37xf32, #tpu.memory_space<smem>>
    %288 = vector.broadcast %287 : f32 to vector<16x128xf32>
    %289 = arith.mulf %250, %288 : vector<16x128xf32>
    %290 = arith.addf %269, %289 : vector<16x128xf32>
    %c3_i32_115 = arith.constant 3 : i32
    %291 = arith.addi %255, %c3_i32_115 : i32
    %c2_i32_116 = arith.constant 2 : i32
    %292 = arith.addi %291, %c2_i32_116 : i32
    %293 = arith.index_cast %292 : i32 to index
    %294 = memref.load %arg3[%293] : memref<37xf32, #tpu.memory_space<smem>>
    %295 = vector.broadcast %294 : f32 to vector<16x128xf32>
    %296 = arith.mulf %250, %295 : vector<16x128xf32>
    %297 = arith.addf %276, %296 : vector<16x128xf32>
    %c6_i32_117 = arith.constant 6 : i32
    %298 = arith.addi %255, %c6_i32_117 : i32
    %c0_i32_118 = arith.constant 0 : i32
    %299 = arith.addi %298, %c0_i32_118 : i32
    %300 = arith.index_cast %299 : i32 to index
    %301 = memref.load %arg3[%300] : memref<37xf32, #tpu.memory_space<smem>>
    %302 = vector.broadcast %301 : f32 to vector<16x128xf32>
    %303 = arith.mulf %252, %302 : vector<16x128xf32>
    %304 = arith.addf %283, %303 : vector<16x128xf32>
    %c6_i32_119 = arith.constant 6 : i32
    %305 = arith.addi %255, %c6_i32_119 : i32
    %c1_i32_120 = arith.constant 1 : i32
    %306 = arith.addi %305, %c1_i32_120 : i32
    %307 = arith.index_cast %306 : i32 to index
    %308 = memref.load %arg3[%307] : memref<37xf32, #tpu.memory_space<smem>>
    %309 = vector.broadcast %308 : f32 to vector<16x128xf32>
    %310 = arith.mulf %252, %309 : vector<16x128xf32>
    %311 = arith.addf %290, %310 : vector<16x128xf32>
    %c6_i32_121 = arith.constant 6 : i32
    %312 = arith.addi %255, %c6_i32_121 : i32
    %c2_i32_122 = arith.constant 2 : i32
    %313 = arith.addi %312, %c2_i32_122 : i32
    %314 = arith.index_cast %313 : i32 to index
    %315 = memref.load %arg3[%314] : memref<37xf32, #tpu.memory_space<smem>>
    %316 = vector.broadcast %315 : f32 to vector<16x128xf32>
    %317 = arith.mulf %252, %316 : vector<16x128xf32>
    %318 = arith.addf %297, %317 : vector<16x128xf32>
    %c1_i32_123 = arith.constant 1 : i32
    %319 = tpu.dynamic_rotate %304 by %c1_i32_123 dim 1 : vector<16x128xf32>, i32 -> vector<16x128xf32>
    %c127_i32 = arith.constant 127 : i32
    %320 = tpu.dynamic_rotate %318 by %c127_i32 dim 1 : vector<16x128xf32>, i32 -> vector<16x128xf32>
    %321 = arith.addf %319, %311 : vector<16x128xf32>
    %322 = arith.addf %321, %320 : vector<16x128xf32>
    %323 = vector.extract_strided_slice %322 {offsets = [0, 0], sizes = [16, 16], strides = [1, 1]} : vector<16x128xf32> to vector<16x16xf32>
    %c0_124 = arith.constant 0 : index
    %c0_125 = arith.constant 0 : index
    %c0_126 = arith.constant 0 : index
    %c0_127 = arith.constant 0 : index
    %324 = vector.load %arg4[%c0_124, %c0_125, %c0_126, %c0_127] : memref<1x1x16x16xf32, #tpu.memory_space<vmem>>, vector<1x1x16x16xf32>
    %325 = vector.shape_cast %324 : vector<1x1x16x16xf32> to vector<16x16xf32>
    %326 = vector.shape_cast %323 : vector<16x16xf32> to vector<1x1x16x16xf32>
    tpu.vector_store %arg4[%c0_124, %c0_125, %c0_126, %c0_127], %326 {strides = array<i32>} : memref<1x1x16x16xf32, #tpu.memory_space<vmem>>, vector<1x1x16x16xf32>,
    return
  }
  func.func @transform_0(%arg0: i32, %arg1: i32) -> (i32, i32, i32, i32) {
    %c0_i32 = arith.constant 0 : i32
    %c0_i32_0 = arith.constant 0 : i32
    %c0_i32_1 = arith.constant 0 : i32
    return %arg0, %arg1, %c0_i32, %c0_i32_0 : i32, i32, i32, i32
  }
  func.func @transform_1(%arg0: i32, %arg1: i32) -> i32 {
    %c0_i32 = arith.constant 0 : i32
    %c0_i32_0 = arith.constant 0 : i32
    return %c0_i32 : i32
  }
  func.func @transform_2(%arg0: i32, %arg1: i32) -> (i32, i32, i32, i32) {
    %c0_i32 = arith.constant 0 : i32
    %c0_i32_0 = arith.constant 0 : i32
    %c0_i32_1 = arith.constant 0 : i32
    %c0_i32_2 = arith.constant 0 : i32
    return %arg0, %c0_i32, %c0_i32_0, %c0_i32_1 : i32, i32, i32, i32
  }
}

</mosaic_0001>

<bundles_post_ra>
// kernel: tpu_custom_call.1
= control target key start
LH: loop header
LB: loop body
LE: loop exit
PB: predicated region body
PF: predicated region fallthrough
CT: control target
= control target key end

     0   :  { %s1607_s0 = inlined_call_operand.hbm [shape: f32[2,4,16,16], index: 0, kind: input, shape index: {}]   ;;  %s1608_s1 = inlined_call_operand.vmem [shape: f32[37], index: 1, kind: input, shape index: {}]   ;;  %s1609_s2 = inlined_call_operand.hbm [shape: f32[2,1,16,16], index: 2, kind: output, shape index: {}]  }
   0x1   :  { %1615 = sst [smem:[#allocation13_spill]] %s1607_s0 }
   0x2   :  { %1616 = sst [smem:[#allocation14_spill]] %s1608_s1 }
   0x3   :  { %7 = vsyncpa [#allocation4], 0 }
   0x4   :  { %9 = vsyncpa [#allocation4 + $0x1], 0 }
   0x5   :  { %10 = vsyncpa [#allocation6], 0 }
   0x6   :  { %11 = vsyncpa [#allocation5], 0 }
   0x7   :  { %13 = vsyncpa [#allocation5 + $0x1], 0  ;;  %s970_s9 = smov 0   ;;  %s972_s10 = smov 0  }
   0x8   :  { %s974_s11 = smov 0   ;;  %s976_s12 = smov 0  }
   0x9   :  { %s978_s13 = smov 0   ;;  %s980_s14 = smov 0  }
   0xa LB: > { %s671_s15 = sadd.s32 4294967295, %s943_s14   ;;  %s672_s16 = sadd.s32 4294967294, %s943_s14   ;;  %s943_s14 = sphi %s980_s14, %s19_s14   ;;  %s939_s13 = sphi %s978_s13, %s1639_s13   ;;  %s935_s12 = sphi %s976_s12, %s1638_s12   ;;  %s931_s11 = sphi %s974_s11, %s1637_s11   ;;  %s927_s10 = sphi %s972_s10, %s1636_s10   ;;  %s923_s9 = sphi %s970_s9, %s1635_s9  }
   0xb   : > { %s40_s17 = sadd.s32 1, %s931_s11  ;;  %p47_p0 = scmp.ne.s32.totalorder %s931_s11, %s927_s10 }
   0xc   : > { %p48_p1 = scmp.eq.s32.totalorder %s943_s14, 0  ;;  %p53_p2 = scmp.ne.s32.totalorder %s927_s10, %s923_s9 }
   0xd   : > { %p1008_p3 = scmp.eq.s32.totalorder %s671_s15, 0  ;;  %p98_p4 = scmp.eq.s32.totalorder %s671_s15, 1 }
   0xe   : > { %p1012_p5 = por %p48_p1, %p47_p0  ;;  %p104_p6 = scmp.eq.s32.totalorder %s672_s16, 1 }
   0xf   : > { %s1617_s18 = scalar_select %p1008_p3, 1, 0 }
  0x10   : > { %p1018_p7 = por %p1008_p3, %p53_p2  ;;  %p1022_p8 = por %p98_p4, %p47_p0 }
  0x11   : > { %p1026_p9 = por %p104_p6, %p53_p2  ;;  %p673_p10 = scmp.ge.s32.totalorder %s943_s14, 1 }
  0x12   : > { %s1619_s20 = scalar_select %p1018_p7, 1, 0 }
  0x13   : > { %s1620_s21 = scalar_select %p1022_p8, 1, 0 }
  0x14   : > { %s1621_s22 = scalar_select %p1026_p9, 1, 0 }
  0x15   : > { %p111_p11 = scmp.lt.s32.totalorder %s943_s14, 3  ;;  %s1622_s1 = sld [smem:[#allocation14_spill]] }
  0x16   : > { %p753_p0 = scmp.lt.s32.totalorder %s943_s14, 2  ;;  %s31_s29 = sadd.s32 1, %s939_s13 }
  0x17   : > { %p1035_p12 = pnand %p673_p10, %p111_p11  ;;  %p1056_p6 = scmp.ge.s32.totalorder %s31_s29, 2 }
  0x18   : > { %p1045_p2 = pnand %p753_p0, %p1012_p5  ;;  %s135_s3 = sand.u32 1, %s931_s11  }
  0x19   : > { %p740_p1 = pneg %p1035_p12 }
  0x1b   : > { %s124_s25 = sshll.u32 %s1622_s1, 4  ;;  %p1051_p4 = pnand %p740_p1, %p1008_p3  ;;  %s125_s25 = int_to_ptr.vmem [resolvable:$true] %s124_s25 }
  0x1c   : > { %s812_s4 = scalar_lea.vmem %s125_s25, 16  ;;  %p820_p13 = scmp.lt.s32.totalorder %s125_s25, %s125_s25 }
  0x1d   : > { %p813_p10 = scmp.ne.s32.totalorder %s125_s25, %s812_s4  ;;  %p814_p11 = pneg %p1051_p4 }
  0x1e   : > { %p821_p9 = scmp.lt.s32.totalorder %s812_s4, %s812_s4 }
  0x1f   : > { %p815_p5 = pnand %p814_p11, %p813_p10 }
  0x20   : > { %p822_p8 = por %p821_p9, %p820_p13 }
  0x21   : > { %p816_p0 = pneg %p815_p5 }
  0x23   : > { %p823_p1 = pnand %p822_p8, %p816_p0 }
  0x25   : > { %826 = shalt.err (!%p823_p1)
}
  0x26   : > { %s945_s5 = smov [#allocation7]   ;;  %s1641_s29 = smov (%p1056_p6, %s31_s29), 0 }
  0x27   : > { %743 = dma.vmem_to_smem (!%p1051_p4), %s125_s25, 16, %s945_s5, [#allocation6]  }
  0x28   : > { %1627 = sst [smem:[#allocation12_spill]] %s1641_s29  ;;  %s676_s6 = sshll.u32 %s135_s3, 6 }
  0x29   : > { %s35_s7 = ssub.s32 %s939_s13, %s1641_s29  ;;  %s730_s8 = sshll.u32 %s939_s13, 10 }
  0x2a   : > { %p38_p9 = scmp.eq.s32.totalorder %s35_s7, 0  ;;  %s1628_s0 = sld [smem:[#allocation13_spill]] }
  0x2b   : > { %s139_s23 = scalar_lea.vmem [#allocation3], %s676_s6  ;;  %s1084_s28 = scalar_lea.sflag [#allocation4], %s135_s3 }
  0x2c   : > { %s149_s24 = sshll.u32 %s139_s23, 4  ;;  %p829_p13 = pneg %p1045_p2  ;;  %s1082_s24 = int_to_ptr.vmem [resolvable:$true] %s149_s24 }
  0x2d   : > { %s1080_s25 = scalar_select %p38_p9, %s931_s11, %s40_s17  }
  0x30   : > { %s1075_s19 = scalar_lea.hbm %s1628_s0, %s730_s8  ;;  %s832_s6 = scalar_lea.hbm %s1628_s0, 2048 }
  0x31   : > { %s827_s30 = scalar_lea.hbm %s1075_s19, 1024  ;;  %p833_p10 = scmp.lt.u32.totalorder %s1075_s19, %s1628_s0 }
  0x32   : > { %p828_p8 = scmp.ne.s32.totalorder %s1075_s19, %s827_s30  ;;  %p834_p11 = scmp.lt.u32.totalorder %s832_s6, %s827_s30 }
  0x33   : > { %p836_p0 = scmp.lt.u32.totalorder %s827_s30, %s1075_s19 }
  0x34   : > { %p830_p4 = pnand %p829_p13, %p828_p8  ;;  %p835_p5 = por %p834_p11, %p833_p10 }
  0x36   : > { %p831_p6 = pneg %p830_p4  ;;  %p837_p1 = por %p836_p0, %p835_p5 }
  0x38   : > { %p838_p9 = pnand %p837_p1, %p831_p6 }
  0x3a   : > { %841 = shalt.err (!%p838_p9)
}
  0x3b   : > { %s842_s17 = scalar_lea.vmem %s1082_s24, 1024  ;;  %s946_s3 = smov [#allocation3]  }
  0x3c   : > { %p843_p8 = scmp.ne.s32.totalorder %s1082_s24, %s842_s17  ;;  %s847_s15 = sshll.u32 %s946_s3, 4  ;;  %s848_s15 = int_to_ptr.vmem [resolvable:$false] %s847_s15 }
  0x3d   : > { %s849_s16 = scalar_lea.vmem %s848_s15, 2048  ;;  %p850_p7 = scmp.lt.s32.totalorder %s1082_s24, %s848_s15 }
  0x3e   : > { %p845_p4 = pnand %p843_p8, %p829_p13  ;;  %p851_p10 = scmp.lt.s32.totalorder %s849_s16, %s842_s17 }
  0x40   : > { %p846_p3 = pneg %p845_p4  ;;  %p852_p11 = por %p851_p10, %p850_p7 }
  0x42   : > { %p853_p5 = pnand %p852_p11, %p846_p3 }
  0x44   : > { %856 = shalt.err (!%p853_p5)
}
  0x45   : > { %s947_s23 = smov 128   ;;  %s948_s30 = smov 8  }
  0x46   : > { %747 = dma.hbm_to_vmem [thread:$0]  (!%p1045_p2), %s1075_s19, 1024, %s1082_s24, %s1084_s28, %s947_s23, %s947_s23, %s948_s30  }
  0x47   : > { %161 = sbr.rel (%p1035_p12) target bundleno = 276 (0x114), region = 28  ;;  %s1115_s4 = sand.u32 (!%p1035_p12), 1, %s927_s10  }
  0x48   : > { %s680_s5 = sshll.u32 (!%p1035_p12), %s1115_s4, 6  ;;  %s164_s6 = scalar_lea.sflag (!%p1035_p12), [#allocation4], %s1115_s4 }
  0x49   : > { %s1119_s7 = scalar_lea.vmem (!%p1035_p12), [#allocation3], %s680_s5  ;;  %p1629_p3 = scmp.ne.s32.totalorder (!%p1035_p12), %s1619_s20, 0 }
  0x4e   : > { %910 = dma.done.wait (%p1629_p3), %s164_s6, 1024  }
  0x4f   : > { %912 = vsyncadd (%p1629_p3), %s164_s6, 4294966272  ;;  %p1630_p7 = scmp.ne.s32.totalorder %s1617_s18, 0 }
  0x51   : > { %914 = dma.done.wait (%p1630_p7), [#allocation6], 16  }
  0x52   : > { %916 = vsyncadd (%p1630_p7), [#allocation6], 4294967280 }
  0x53   : > { %176 = sfence }
  0x54   : > { %v212_v0 = vld [vmem:[%s1119_s7] sm:$0xff]  ;;  %v213_v1 = vld [vmem:[%s1119_s7 + $0x8] sm:$0xff]  ;;  %vm214_vm0 = vcmask 130048   ;;  %v949_v2 = vmov 0.0   ;;  %v223_v3 = vlaneseq  ;;  %s1139_s18 = sld [smem:[#allocation7]]  ;;  %s1141_s20 = sld [smem:[#allocation7 + $0x3]] }
  0x55   : > { %199 = vst [vmem:[#allocation2] sm:$0xff] %v949_v2  ;;  %200 = vst [vmem:[#allocation2 + $0x8] sm:$0xff] %v949_v2  ;;  %s1145_s26 = sld [smem:[#allocation7 + $0x6]]  ;;  %v692_v4 = vld [vmem:[%s1119_s7 + $0x10] sm:$0xff]  ;;  %v693_v5 = vld [vmem:[%s1119_s7 + $0x18] sm:$0xff]  ;;  %s1155_s27 = sld [smem:[#allocation7 + $0x9]] }
  0x56   : > { %202 = vst [vmem:[#allocation2 + $0x18] sm:$0xff] %v949_v2  ;;  %203 = vst [vmem:[#allocation2 + $0x20] sm:$0xff] %v949_v2  ;;  %v703_v6 = vld [vmem:[%s1119_s7 + $0x20] sm:$0xff]  ;;  %v704_v7 = vld [vmem:[%s1119_s7 + $0x28] sm:$0xff]  ;;  %v1159_v9 = vshrl.u32 %v223_v3, 7  ;;  %s1162_s19 = sld [smem:[#allocation7 + $0xc]] }
  0x57   : > { %205 = vst [vmem:[#allocation2 + $0x30] sm:$0xff] %v949_v2  ;;  %206 = vst [vmem:[#allocation2 + $0x38] sm:$0xff] %v949_v2  ;;  %v714_v8 = vld [vmem:[%s1119_s7 + $0x30] sm:$0xff]  ;;  %v715_v10 = vld [vmem:[%s1119_s7 + $0x38] sm:$0xff]  ;;  %v1166_v11 = vrot.slane %v949_v2, 7  ;;  %s1169_s24 = sld [smem:[#allocation7 + $0xf]] }
  0x58   : > { %208 = vst [vmem:[#allocation2 + $0x48] sm:$0xff] %v949_v2  ;;  %209 = vst [vmem:[#allocation2 + $0x50] sm:$0xff] %v949_v2  ;;  %vm225_vm1 = vcmp.lt.s32.totalorder %v1159_v9, 1  ;;  %vm231_vm2 = vcmp.lt.s32.totalorder %v1159_v9, 7  ;;  %s1184_s28 = sld [smem:[#allocation7 + $0x12]]  ;;  %s1209_s8 = sld [smem:[#allocation7 + $0x15]] }
  0x59   : > { %215 = vst.msk [vmem:[#allocation2] sm:$0xff] %vm214_vm0, %v212_v0  ;;  %216 = vst.msk [vmem:[#allocation2 + $0x8] sm:$0xff] %vm214_vm0, %v213_v1  ;;  %s1226_s17 = sld [smem:[#allocation7 + $0x18]]  ;;  %s1241_s3 = sld [smem:[#allocation7 + $0x1b]]  ;;  %v1290_v56 = vrot.slane %v949_v2, 1 }
  0x5a   : > { %301 = vst.msk [vmem:[#allocation2 + $0x18] sm:$0xff] %vm214_vm0, %v692_v4  ;;  %302 = vst.msk [vmem:[#allocation2 + $0x20] sm:$0xff] %vm214_vm0, %v693_v5  ;;  %v257_v12 = vstv %s1141_s20  ;;  %v236_v15 = vstv %s1139_s18  ;;  %s1246_s15 = sld [smem:[#allocation7 + $0x1e]]  ;;  %s1248_s16 = sld [smem:[#allocation7 + $0x21]] }
  0x5b   : > { %385 = vst.msk [vmem:[#allocation2 + $0x30] sm:$0xff] %vm214_vm0, %v703_v6  ;;  %386 = vst.msk [vmem:[#allocation2 + $0x38] sm:$0xff] %vm214_vm0, %v704_v7  ;;  %v278_v19 = vstv %s1145_s26  ;;  %v320_v27 = vstv %s1155_s27  ;;  %s1262_s23 = sld [smem:[#allocation7 + $0x2]]  ;;  %s1267_s30 = sld [smem:[#allocation7 + $0x5]] }
  0x5c   : > { %468 = vst.msk [vmem:[#allocation2 + $0x48] sm:$0xff] %vm214_vm0, %v714_v8  ;;  %469 = vst.msk [vmem:[#allocation2 + $0x50] sm:$0xff] %vm214_vm0, %v715_v10  ;;  %v341_v33 = vstv %s1162_s19  ;;  %s1270_s5 = sld [smem:[#allocation7 + $0x8]]  ;;  %s1272_s6 = sld [smem:[#allocation7 + $0xb]] }
  0x5d   : > { %v362_v39 = vstv %s1169_s24  ;;  %s1287_s7 = sld [smem:[#allocation7 + $0xe]]  ;;  %s1295_s0 = sld [smem:[#allocation7 + $0x11]] }
  0x5e   : > { %v403_v45 = vstv %s1184_s28  ;;  %v424_v49 = vstv %s1209_s8  ;;  %s1316_s1 = sld [smem:[#allocation7 + $0x14]]  ;;  %s1322_s29 = sld [smem:[#allocation7 + $0x17]] }
  0x5f   : > { %v445_v55 = vstv %s1226_s17  ;;  %v486_v62 = vstv %s1241_s3  ;;  %s1338_s20 = sld [smem:[#allocation7 + $0x1a]]  ;;  %s1399_s26 = sld [smem:[#allocation7 + $0x1]] }
  0x60   : > { %v1171_v13 = vld [vmem:[#allocation2] sm:$0xff]  ;;  %v1173_v14 = vld [vmem:[#allocation2 + $0x8] sm:$0xff]  ;;  %v507_v4 = vstv %s1246_s15  ;;  %v528_v5 = vstv %s1248_s16  ;;  %s1425_s18 = sld [smem:[#allocation7 + $0x7]]  ;;  %s1439_s27 = sld [smem:[#allocation7 + $0x24]] }
  0x61   : > { %v220_v16 = vrot.slane %v1171_v13, 7  ;;  %v228_v17 = vrot.slane %v1171_v13, 1  ;;  %v229_v18 = vrot.slane %v1173_v14, 1  ;;  %v1182_v20 = vld [vmem:[#allocation2 + $0x18] sm:$0xff]  ;;  %v258_v21 = vmul.f32 %v257_v12, %v1171_v13  ;;  %v1189_v22 = vld [vmem:[#allocation2 + $0x20] sm:$0xff]  ;;  %s1442_s19 = sld [smem:[#allocation7 + $0xa]] }
  0x62   : > { %v306_v23 = vrot.slane %v1182_v20, 7  ;;  %v311_v26 = vrot.slane %v1182_v20, 1  ;;  %v1207_v28 = vld [vmem:[#allocation2 + $0x30] sm:$0xff]  ;;  %v312_v32 = vrot.slane %v1189_v22, 1  ;;  %v1231_v36 = vld [vmem:[#allocation2 + $0x38] sm:$0xff]  ;;  %v342_v41 = vmul.f32 %v341_v33, %v1182_v20  ;;  %s1456_s24 = sld [smem:[#allocation7 + $0xd]] }
  0x63   : > { %v1197_v24 = vsel %vm225_vm1, %v1166_v11, %v220_v16  ;;  %v1203_v25 = vsel %vm231_vm2, %v228_v17, %v229_v18  ;;  %v390_v37 = vrot.slane %v1207_v28, 7  ;;  %v395_v43 = vrot.slane %v1207_v28, 1  ;;  %v1260_v46 = vld [vmem:[#allocation2 + $0x48] sm:$0xff]  ;;  %v1277_v52 = vld [vmem:[#allocation2 + $0x50] sm:$0xff]  ;;  %s1473_s28 = sld [smem:[#allocation7 + $0x10]]  ;;  %s1484_s8 = sld [smem:[#allocation7 + $0x13]] }
  0x64   : > { %v237_v29 = vmul.f32 %v236_v15, %v1197_v24  ;;  %v279_v30 = vmul.f32 %v278_v19, %v1203_v25  ;;  %v1222_v31 = vsel %vm225_vm1, %v1166_v11, %v306_v23  ;;  %v1238_v38 = vsel %vm231_vm2, %v311_v26, %v312_v32  ;;  %s1493_s17 = sld [smem:[#allocation7 + $0x16]]  ;;  %s1499_s3 = sld [smem:[#allocation7 + $0x19]] }
  0x65   : > { %v321_v35 = vmul.f32 %v320_v27, %v1222_v31  ;;  %v1255_v42 = vsel %vm225_vm1, %v1166_v11, %v390_v37  ;;  %v396_v44 = vrot.slane %v1231_v36, 1  ;;  %v363_v48 = vmul.f32 %v362_v39, %v1238_v38  ;;  %s951_s15 = smov 127   ;;  %s1519_s16 = sld [smem:[#allocation7 + $0x1f]] }
  0x66   : > { %v260_v34 = vadd.f32 %v258_v21, %v237_v29  ;;  %v404_v51 = vmul.f32 %v403_v45, %v1255_v42  ;;  %v473_v53 = vrot.slane %v1260_v46, 7  ;;  %v425_v58 = vmul.f32 %v424_v49, %v1207_v28  ;;  %p1631_p2 = scmp.ne.s32.totalorder %s1620_s21, 0 }
  0x67   : > { %v1284_v54 = vsel %vm231_vm2, %v395_v43, %v396_v44  ;;  %v478_v60 = vrot.slane %v1260_v46, 1  ;;  %v479_v61 = vrot.slane %v1277_v52, 1  ;;  %v221_v63 = vrot.slane %v1173_v14, 7 }
  0x68   : > { %v281_v40 = vadd.f32 %v279_v30, %v260_v34  ;;  %v1302_v59 = vsel %vm225_vm1, %v1166_v11, %v473_v53  ;;  %v1311_v0 = vmul.f32 %v257_v12, %v1173_v14  ;;  %v446_v2 = vmul.f32 %v445_v55, %v1284_v54 }
  0x69   : > { %v307_v3 = vrot.slane %v1189_v22, 7  ;;  %v250_v6 = vstv %s1262_s23  ;;  %v487_v8 = vmul.f32 %v486_v62, %v1302_v59  ;;  %v271_v11 = vstv %s1267_s30  ;;  %s1354_s23 = sld [smem:[#allocation7 + $0x1d]]  ;;  %s1392_s30 = sld [smem:[#allocation7 + $0x23]] }
  0x6a   : > { %v323_v47 = vadd.f32 %v321_v35, %v281_v40  ;;  %v251_v10 = vmul.f32 %v250_v6, %v1197_v24  ;;  %v1333_v12 = vsel %vm231_vm2, %v478_v60, %v479_v61  ;;  %v272_v17 = vmul.f32 %v271_v11, %v1171_v13 }
  0x6b   : > { %v292_v21 = vstv %s1270_s5  ;;  %v334_v26 = vstv %s1272_s6  ;;  %v391_v29 = vrot.slane %v1231_v36, 7  ;;  %v508_v34 = vmul.f32 %v507_v4, %v1260_v46  ;;  %s1511_s5 = sld [smem:[#allocation7 + $0x1c]]  ;;  %s1527_s6 = sld [smem:[#allocation7 + $0x22]] }
  0x6c   : > { %v344_v50 = vadd.f32 %v342_v41, %v323_v47  ;;  %v293_v35 = vmul.f32 %v292_v21, %v1203_v25  ;;  %v1350_v40 = vsel %vm231_vm2, %v229_v18, %v1290_v56  ;;  %v274_v41 = vadd.f32 %v272_v17, %v251_v10 }
  0x6d   : > { %v335_v43 = vmul.f32 %v334_v26, %v1222_v31  ;;  %v355_v47 = vstv %s1287_s7  ;;  %v376_v18 = vstv %s1295_s0  ;;  %s1380_s0 = sld [smem:[#allocation7 + $0x20]]  ;;  %s682_s7 = sshll.u32 %s1115_s4, 4 }
  0x6e   : > { %v365_v57 = vadd.f32 %v363_v48, %v344_v50  ;;  %v529_v50 = vmul.f32 %v528_v5, %v1333_v12  ;;  %v295_v60 = vadd.f32 %v293_v35, %v274_v41  ;;  %v474_v35 = vrot.slane %v1277_v52, 7 }
  0x6f   : > { %v500_v41 = vstv %s1354_s23 }
  0x70   : > { %v406_v1 = vadd.f32 %v404_v51, %v365_v57  ;;  %v1363_v51 = vsel %vm225_vm1, %v220_v16, %v221_v63  ;;  %v1370_v57 = vsel %vm225_vm1, %v306_v23, %v307_v3  ;;  %v356_v16 = vmul.f32 %v355_v47, %v1182_v20 }
  0x71   : > { %v280_v63 = vmul.f32 %v278_v19, %v1350_v40  ;;  %v1389_v23 = vsel %vm225_vm1, %v390_v37, %v391_v29  ;;  %v337_v3 = vadd.f32 %v335_v43, %v295_v60  ;;  %v322_v19 = vmul.f32 %v320_v27, %v1370_v57 }
  0x72   : > { %v427_v7 = vadd.f32 %v425_v58, %v406_v1  ;;  %v1377_v58 = vsel %vm231_vm2, %v312_v32, %v1290_v56  ;;  %v238_v32 = vmul.f32 %v236_v15, %v1363_v51  ;;  %v343_v37 = vmul.f32 %v341_v33, %v1189_v22 }
  0x73   : > { %v364_v10 = vmul.f32 %v362_v39, %v1377_v58  ;;  %v273_v29 = vmul.f32 %v271_v11, %v1173_v14  ;;  %v358_v15 = vadd.f32 %v356_v16, %v337_v3  ;;  %v405_v27 = vmul.f32 %v403_v45, %v1389_v23 }
  0x74   : > { %v448_v30 = vadd.f32 %v446_v2, %v427_v7  ;;  %v417_v2 = vstv %s1316_s1  ;;  %v377_v7 = vmul.f32 %v376_v18, %v1238_v38  ;;  %s1413_s1 = sld [smem:[#allocation7 + $0x4]]  ;;  %v294_v33 = vmul.f32 %v292_v21, %v1350_v40 }
  0x75   : > { %v252_v43 = vmul.f32 %v250_v6, %v1363_v51  ;;  %v1432_v45 = vsel %vm231_vm2, %v396_v44, %v1290_v56  ;;  %v426_v21 = vmul.f32 %v424_v49, %v1231_v36  ;;  %v521_v60 = vstv %s1380_s0  ;;  %s731_s0 = sshll.u32 %s935_s12, 8  ;;  %s952_s12 = smov [#allocation8]  }
  0x76   : > { %v489_v48 = vadd.f32 %v487_v8, %v448_v30  ;;  %v438_v8 = vstv %s1322_s29  ;;  %v418_v30 = vmul.f32 %v417_v2, %v1255_v42  ;;  %s950_s29 = smov 1   ;;  %v379_v11 = vadd.f32 %v377_v7, %v358_v15 }
  0x77   : > { %v439_v39 = vmul.f32 %v438_v8, %v1207_v28  ;;  %v1448_v44 = vsel %vm225_vm1, %v473_v53, %v474_v35  ;;  %v357_v49 = vmul.f32 %v355_v47, %v1189_v22  ;;  %v1466_v53 = vsel %vm231_vm2, %v479_v61, %v1290_v56 }
  0x78   : > { %v510_v1 = vadd.f32 %v508_v34, %v489_v48  ;;  %v459_v34 = vstv %s1338_s20  ;;  %v261_v48 = vadd.f32 %v1311_v0, %v238_v32  ;;  %v420_v0 = vadd.f32 %v418_v30, %v379_v11  ;;  %s192_s20 = scalar_lea.vmem [#allocation8], %s682_s7 }
  0x79   : > { %v460_v6 = vmul.f32 %v459_v34, %v1284_v54  ;;  %v542_v32 = vstv %s1392_s30  ;;  %v378_v47 = vmul.f32 %v376_v18, %v1377_v58  ;;  %v419_v9 = vmul.f32 %v417_v2, %v1389_v23  ;;  %s575_s23 = sshll.u32 %s192_s20, 4  ;;  %s1552_s23 = int_to_ptr.vmem [resolvable:$true] %s575_s23 }
  0x7a   : > { %v531_v17 = vadd.f32 %v529_v50, %v510_v1  ;;  %v336_v50 = vmul.f32 %v334_v26, %v1370_v57  ;;  %v282_v16 = vadd.f32 %v280_v63, %v261_v48  ;;  %v275_v1 = vadd.f32 %v273_v29, %v252_v43 }
  0x7b   : > { %v501_v26 = vmul.f32 %v500_v41, %v1302_v59  ;;  %v441_v3 = vadd.f32 %v439_v39, %v420_v0  ;;  %v447_v29 = vmul.f32 %v445_v55, %v1432_v45  ;;  %v488_v55 = vmul.f32 %v486_v62, %v1448_v44 }
  0x7c   : > { %547 = vrot.lane.b32.xlu0 %v531_v17, %s950_s29  ;;  %v324_v63 = vadd.f32 %v322_v19, %v282_v16  ;;  %v296_v7 = vadd.f32 %v294_v33, %v275_v1  ;;  %v243_v17 = vstv %s1399_s26  ;;  %v522_v19 = vmul.f32 %v521_v60, %v1260_v46 }
  0x7d   : > { %v462_v15 = vadd.f32 %v460_v6, %v441_v3  ;;  %v264_v33 = vstv %s1413_s1  ;;  %v543_v56 = vmul.f32 %v542_v32, %v1333_v12  ;;  %v244_v61 = vmul.f32 %v243_v17, %v1197_v24  ;;  %s1557_s1 = scalar_lea.hbm %s1609_s2, %s731_s0 }
  0x7e   : > { %v345_v30 = vadd.f32 %v343_v37, %v324_v63  ;;  %v338_v35 = vadd.f32 %v336_v50, %v296_v7  ;;  %v285_v37 = vstv %s1425_s18  ;;  %v509_v43 = vmul.f32 %v507_v4, %v1277_v52  ;;  %s857_s18 = scalar_lea.vmem %s1552_s23, 256 }
  0x7f   : > { %v503_v18 = vadd.f32 %v501_v26, %v462_v15  ;;  %v440_v62 = vmul.f32 %v438_v8, %v1231_v36  ;;  %v265_v48 = vmul.f32 %v264_v33, %v1171_v13  ;;  %v211_v2 = vstv %s1439_s27  ;;  %p858_p12 = scmp.ne.s32.totalorder %s1552_s23, %s857_s18  ;;  %s861_s27 = sshll.u32 %s952_s12, 4  ;;  %s862_s27 = int_to_ptr.vmem [resolvable:$false] %s861_s27 }
  0x80   : > { %v366_v39 = vadd.f32 %v364_v10, %v345_v30  ;;  %v359_v11 = vadd.f32 %v357_v49, %v338_v35  ;;  %v327_v24 = vstv %s1442_s19  ;;  %v461_v10 = vmul.f32 %v459_v34, %v1432_v45  ;;  %s863_s19 = scalar_lea.vmem %s862_s27, 512  ;;  %p864_p0 = scmp.lt.s32.totalorder %s1552_s23, %s862_s27 }
  0x81   : > { %v524_v50 = vadd.f32 %v522_v19, %v503_v18  ;;  %v286_v16 = vmul.f32 %v285_v37, %v1203_v25  ;;  %v246_v1 = vadd.f32 %v244_v61, %v211_v2  ;;  %v245_v4 = vmul.f32 %v243_v17, %v1363_v51  ;;  %p859_p13 = pnand %p858_p12, %p1631_p2  ;;  %p865_p1 = scmp.lt.s32.totalorder %s863_s19, %s857_s18 }
  0x82   : > { %v407_v6 = vadd.f32 %v405_v27, %v366_v39  ;;  %v380_v0 = vadd.f32 %v378_v47, %v359_v11  ;;  %v348_v26 = vstv %s1456_s24  ;;  %v530_v27 = vmul.f32 %v528_v5, %v1466_v53 }
  0x83   : > { %v545_v8 = vadd.f32 %v543_v56, %v524_v50  ;;  %v328_v3 = vmul.f32 %v327_v24, %v1222_v31  ;;  %v267_v63 = vadd.f32 %v265_v48, %v246_v1  ;;  %v266_v25 = vmul.f32 %v264_v33, %v1173_v14  ;;  %p860_p6 = pneg %p859_p13  ;;  %p866_p9 = por %p865_p1, %p864_p0 }
  0x84   : > { %v428_v49 = vadd.f32 %v426_v21, %v407_v6  ;;  %v421_v13 = vadd.f32 %v419_v9, %v380_v0  ;;  %v502_v34 = vmul.f32 %v500_v41, %v1448_v44  ;;  %v369_v7 = vstv %s1473_s28 }
  0x85   : > { %551 = vrot.lane.b32.xlu1 %v545_v8, %s951_s15  ;;  %v349_v5 = vmul.f32 %v348_v26, %v1182_v20  ;;  %v288_v31 = vadd.f32 %v286_v16, %v267_v63  ;;  %v287_v17 = vmul.f32 %v285_v37, %v1350_v40  ;;  %v247_v47 = vadd.f32 %v245_v4, %v211_v2  ;;  %p867_p8 = pnand %p866_p9, %p860_p6 }
  0x86   : > { %v449_v51 = vadd.f32 %v447_v29, %v428_v49  ;;  %v442_v21 = vadd.f32 %v440_v62, %v421_v13  ;;  %v523_v14 = vmul.f32 %v521_v60, %v1277_v52  ;;  %v410_v15 = vstv %s1484_s8 }
  0x87   : > { %v370_v29 = vmul.f32 %v369_v7, %v1238_v38  ;;  %v330_v30 = vadd.f32 %v328_v3, %v288_v31  ;;  %v329_v35 = vmul.f32 %v327_v24, %v1370_v57  ;;  %v268_v20 = vadd.f32 %v266_v25, %v247_v47 }
  0x88   : > { %v490_v41 = vadd.f32 %v488_v55, %v449_v51  ;;  %v463_v19 = vadd.f32 %v461_v10, %v442_v21  ;;  %v544_v33 = vmul.f32 %v542_v32, %v1466_v53  ;;  %v431_v56 = vstv %s1493_s17 }
  0x89   : > { %v411_v60 = vmul.f32 %v410_v15, %v1255_v42  ;;  %v351_v55 = vadd.f32 %v349_v5, %v330_v30  ;;  %v350_v61 = vmul.f32 %v348_v26, %v1189_v22  ;;  %v289_v18 = vadd.f32 %v287_v17, %v268_v20 }
  0x8a   : > { %v511_v40 = vadd.f32 %v509_v43, %v490_v41  ;;  %v504_v9 = vadd.f32 %v502_v34, %v463_v19  ;;  %v452_v57 = vstv %s1499_s3  ;;  %v432_v11 = vmul.f32 %v431_v56, %v1207_v28 }
  0x8b   : > { %v372_v37 = vadd.f32 %v370_v29, %v351_v55  ;;  %v371_v32 = vmul.f32 %v369_v7, %v1377_v58  ;;  %v331_v43 = vadd.f32 %v329_v35, %v289_v18  ;;  %v493_v48 = vstv %s1511_s5 }
  0x8c   : > { %v532_v38 = vadd.f32 %v530_v27, %v511_v40  ;;  %v525_v39 = vadd.f32 %v523_v14, %v504_v9  ;;  %v453_v42 = vmul.f32 %v452_v57, %v1284_v54  ;;  %v412_v22 = vmul.f32 %v410_v15, %v1389_v23 }
  0x8d   : > { %v413_v2 = vadd.f32 %v411_v60, %v372_v37  ;;  %v352_v50 = vadd.f32 %v350_v61, %v331_v43  ;;  %v514_v6 = vstv %s1519_s16  ;;  %v494_v28 = vmul.f32 %v493_v48, %v1302_v59 }
  0x8e   : > { %549 = vrot.lane.b32.xlu0 %v532_v38, %s950_s29  ;;  %v546_v62 = vadd.f32 %v544_v33, %v525_v39  ;;  %v433_v24 = vmul.f32 %v431_v56, %v1231_v36  ;;  %v535_v10 = vstv %s1527_s6  ;;  %v515_v16 = vmul.f32 %v514_v6, %v1260_v46  ;;  %s562_s29 = scalar_lea.sflag [#allocation5], %s1115_s4 }
  0x8f   : > { %v434_v0 = vadd.f32 %v432_v11, %v413_v2  ;;  %v373_v58 = vadd.f32 %v371_v32, %v352_v50  ;;  %v454_v4 = vmul.f32 %v452_v57, %v1432_v45  ;;  %v536_v23 = vmul.f32 %v535_v10, %v1333_v12 }
  0x90   : > { %553 = vrot.lane.b32.xlu1 %v546_v62, %s951_s15  ;;  %v495_v49 = vmul.f32 %v493_v48, %v1448_v44  ;;  %v516_v59 = vmul.f32 %v514_v6, %v1277_v52  ;;  %v537_v3 = vmul.f32 %v535_v10, %v1466_v53 }
  0x91   : > { %v455_v1 = vadd.f32 %v453_v42, %v434_v0  ;;  %v414_v54 = vadd.f32 %v412_v22, %v373_v58 }
  0x93   : > { %v496_v8 = vadd.f32 %v494_v28, %v455_v1  ;;  %v435_v13 = vadd.f32 %v433_v24, %v414_v54 }
  0x95   : > { %v517_v26 = vadd.f32 %v515_v16, %v496_v8  ;;  %v456_v36 = vadd.f32 %v454_v4, %v435_v13 }
  0x97   : > { %v538_v27 = vadd.f32 %v536_v23, %v517_v26  ;;  %v497_v46 = vadd.f32 %v495_v49, %v456_v36 }
  0x99   : > { %v518_v63 = vadd.f32 %v516_v59, %v497_v46 }
  0x9b   : > { %v539_v25 = vadd.f32 %v537_v3, %v518_v63 }
  0xee   : > { %v548_v45 = vpop.permute.xlu0 %547 }
  0xef   : > { %v555_v34 = vadd.f32 %v548_v45, %v538_v27 }
  0xf7   : > { %v552_v12 = vpop.permute.xlu1 %551 }
  0xf8   : > { %v557_v51 = vadd.f32 %v555_v34, %v552_v12 }
  0xfa   : > { %559 = vst.msk [vmem:[%s192_s20] sm:$0xff] %vm214_vm0, %v557_v51 }
 0x100   : > { %v550_v52 = vpop.permute.xlu0 %549 }
 0x101   : > { %v556_v44 = vadd.f32 %v550_v52, %v539_v25 }
 0x102   : > { %v554_v53 = vpop.permute.xlu1 %553 }
 0x103   : > { %v558_v21 = vadd.f32 %v556_v44, %v554_v53 }
 0x105   : > { %560 = vst.msk [vmem:[%s192_s20 + $0x8] sm:$0xff] %vm214_vm0, %v558_v21 }
 0x106   : > { %870 = shalt.err (!%p867_p8)
}
 0x107   : > { %s871_s24 = scalar_lea.hbm %s1557_s1, 256  ;;  %s875_s17 = scalar_lea.hbm %s1609_s2, 512 }
 0x108   : > { %p872_p4 = scmp.ne.s32.totalorder %s1557_s1, %s871_s24  ;;  %p876_p5 = scmp.lt.u32.totalorder %s1557_s1, %s1609_s2 }
 0x109   : > { %p877_p3 = scmp.lt.u32.totalorder %s875_s17, %s871_s24  ;;  %p879_p12 = scmp.lt.u32.totalorder %s871_s24, %s1557_s1 }
 0x10a   : > { %p873_p10 = pnand %p872_p4, %p1631_p2 }
 0x10b   : > { %p878_p7 = por %p877_p3, %p876_p5 }
 0x10c   : > { %p874_p11 = pneg %p873_p10 }
 0x10d   : > { %p880_p13 = por %p879_p12, %p878_p7 }
 0x10f   : > { %p881_p6 = pnand %p880_p13, %p874_p11 }
 0x111   : > { %884 = shalt.err (!%p881_p6)
}
 0x112   : > { %s953_s5 = smov 128   ;;  %s954_s16 = smov 8  }
 0x113   : > { %738 = dma.vmem_to_hbm [thread:$0]  (%p1631_p2), %s1552_s23, 256, %s1557_s1, %s562_s29, %s953_s5, %s953_s5, %s954_s16  }
 0x114 PF: > { %s590_s6 = sand.u32 1, %s923_s9   ;;  %p1632_p0 = scmp.ne.s32.totalorder %s1621_s22, 0 }
 0x115   : > { %p1633_p1 = scmp.ge.s32.totalorder %s943_s14, 2  ;;  %s591_s7 = scalar_lea.sflag [#allocation5], %s590_s6 }
 0x117   : > { %p749_p9 = pnand %p1633_p1, %p1632_p0 }
 0x119   : > { %918 = dma.done.wait (!%p749_p9), %s591_s7, 256  }
 0x11a   : > { %920 = vsyncadd (!%p749_p9), %s591_s7, 4294967040  ;;  %s19_s14 = sadd.s32 1, %s943_s14   ;;  %s1634_s21 = sld [smem:[#allocation12_spill]] }
 0x11b   : > { %p16_p8 = scmp.ge.s32.totalorder %s19_s14, 4   ;;  %s1635_s9 = smov %s927_s10 }
 0x11c   : > { %s1636_s10 = smov %s931_s11  ;;  %s1637_s11 = smov %s1080_s25 }
 0x11d   : > { %s1638_s12 = smov %s939_s13  ;;  %18 = sbr.rel (!%p16_p8) target bundleno = 10 (0xa), region = 88 }
 0x120   : > { %s1639_s13 = smov %s1634_s21 }
 0x124   :  { %596 = vsyncpa [#allocation4], 1 }
 0x125   :  { %598 = vsyncpa [#allocation4 + $0x1], 1 }
 0x126   :  { %599 = vsyncpa [#allocation5], 1 }
 0x127   :  { %601 = vsyncpa [#allocation5 + $0x1], 1 }
 0x128   :  { %602 = vsyncpa [#allocation6], 1 }
 0x129   :  { %604 = vsyncpa [#allocation6 + $0x1], 1 }

</bundles_post_ra>
